<compile_context>
chip_gen: v7x
topology: tpu7x:2x2x1
jax: 0.10.0
libtpu: 0.0.40
codegen_flags: <defaults>
</compile_context>

<pallas_src>
import jax
import jax.numpy as jnp
from jax.experimental import pallas as pl
from jax.experimental.pallas import tpu as pltpu


# ----------------------------------------------------------------------------
# Kernels
# ----------------------------------------------------------------------------
def _generator_kernel_fast(x_ref, wt_ref, o_ref):
    """Full-vocab block: one MXU matmul + single-pass stable log_softmax."""
    # Native-dtype operands straight into the MXU; f32 accumulator only.
    logits = jnp.dot(x_ref[...], wt_ref[...],
                     preferred_element_type=jnp.float32)            # (TM, V)
    m = jnp.max(logits, axis=-1, keepdims=True)                     # (TM, 1)
    shifted = logits - m
    lse = jnp.log(jnp.sum(jnp.exp(shifted), axis=-1, keepdims=True))
    o_ref[...] = (shifted - lse).astype(o_ref.dtype)


def _make_generator_kernel_tiled(vocab_size, tv):
    """Vocab-tiled two-pass kernel. Grid = (row tiles, pass, vocab tiles)."""
    needs_mask = (vocab_size % tv) != 0

    def kernel(x_ref, wt_ref, o_ref, m_ref, l_ref):
        p = pl.program_id(1)   # 0: online-LSE pass, 1: normalize/write pass
        v = pl.program_id(2)

        # (TM, TV) logits for this vocab tile; native operands, f32 accum.
        logits = jnp.dot(x_ref[...], wt_ref[...],
                         preferred_element_type=jnp.float32)

        if needs_mask:
            col = (jax.lax.broadcasted_iota(jnp.int32, logits.shape, 1)
                   + v * tv)
            logits_lse = jnp.where(col < vocab_size, logits, -jnp.inf)
        else:
            logits_lse = logits

        @pl.when(jnp.logical_and(p == 0, v == 0))
        def _init():
            m_ref[...] = jnp.full(m_ref.shape, -jnp.inf, m_ref.dtype)
            l_ref[...] = jnp.zeros(l_ref.shape, l_ref.dtype)

        @pl.when(p == 0)
        def _accumulate():
            m_prev = m_ref[...]
            m_new = jnp.maximum(m_prev,
                                jnp.max(logits_lse, axis=-1, keepdims=True))
            l_ref[...] = (l_ref[...] * jnp.exp(m_prev - m_new)
                          + jnp.sum(jnp.exp(logits_lse - m_new),
                                    axis=-1, keepdims=True))
            m_ref[...] = m_new

        @pl.when(p == 1)
        def _normalize():
            lse = m_ref[...] + jnp.log(l_ref[...])
            # Padded (out-of-range) columns/rows are clipped by the out write.
            o_ref[...] = (logits - lse).astype(o_ref.dtype)

    return kernel


# ----------------------------------------------------------------------------
# Wrapper
# ----------------------------------------------------------------------------
def prepare_generator_weight(w):
    """One-time transform of the PyTorch nn.Linear weight (V, H) -> (H, V).

    Do this at parameter-init/load time so no transpose runs per forward.
    """
    return jnp.transpose(w)


def _round_down(x, m):
    return max(m, (x // m) * m)


def _round_up(x, m):
    return ((x + m - 1) // m) * m


def _vmem_budget_bytes():
    """~75% of physical per-core VMEM (96 MiB on v5e/v6e, 48 MiB on v7x)."""
    cap = 64 * 1024 * 1024   # conservative fallback (v7x-sized)
    try:
        cap = int(pltpu.get_tpu_info().vmem_capacity_bytes)
    except Exception:
        pass
    return int(cap * 3 // 4)


def _pick_tiles(M, H, V, x_it, w_it, o_it, block_rows, block_vocab, budget):
    # Sublane packing of the input dtype (bf16 packs 16 rows per vreg tile).
    row_align = max(8, 32 // x_it)

    if M <= row_align:
        tm = M                                   # full dim: no alignment rule
    else:
        tm = _round_down(min(block_rows, M), row_align)
        if tm >= M:
            # Force >= 2 row blocks so v7x's two TensorCores both get work.
            tm = _round_up((M + 1) // 2, row_align)

    # Conservative per-step VMEM estimate: double-buffered blocks + f32
    # intermediates for the logits tile + scratch.
    def fits(tm_, tv_):
        x_b = 2 * tm_ * H * x_it
        w_b = 2 * H * tv_ * w_it
        o_b = 2 * tm_ * tv_ * o_it
        tmp = 2 * tm_ * tv_ * 4
        scr = 4 * tm_ * 4
        return (x_b + w_b + o_b + tmp + scr) <= budget

    lane = 128
    tv_full = V if V % lane == 0 else _round_up(V, lane)

    if block_vocab is not None:
        tv = min(_round_up(block_vocab, lane), tv_full)
    elif fits(tm, tv_full):
        tv = tv_full
    else:
        tv = tv_full
        while tv > lane and not fits(tm, tv):
            tv = _round_down(tv // 2, lane)
        while tm > row_align and not fits(tm, tv):
            tm = _round_down(tm // 2, row_align)

    single_block = tv >= V
    if single_block:
        tv = V
    return tm, tv, single_block


def generator_forward(x, wt, *, block_rows=256, block_vocab=None,
                      out_dtype=None, vmem_budget_bytes=None):
    """log_softmax(x @ wt, axis=-1).

    x:  (..., H) activations.
    wt: (H, V) pre-transposed projection weight (prepare_generator_weight(w)).
    """
    *lead, H = x.shape
    Hw, V = wt.shape
    assert Hw == H, "weight/input hidden-size mismatch"
    out_dtype = x.dtype if out_dtype is None else out_dtype

    x2 = x.reshape(-1, H)
    M = x2.shape[0]

    x_it = jnp.dtype(x.dtype).itemsize
    w_it = jnp.dtype(wt.dtype).itemsize
    o_it = jnp.dtype(out_dtype).itemsize

    budget = (_vmem_budget_bytes() if vmem_budget_bytes is None
              else vmem_budget_bytes)
    tm, tv, single_block = _pick_tiles(M, H, V, x_it, w_it, o_it,
                                       block_rows, block_vocab, budget)
    grid_m = pl.cdiv(M, tm)

    if single_block:
        cost = pl.CostEstimate(
            flops=2 * M * H * V + 5 * M * V,
            transcendentals=M * V,
            bytes_accessed=M * H * x_it + H * V * w_it + M * V * o_it,
        )
        out = pl.pallas_call(
            _generator_kernel_fast,
            out_shape=jax.ShapeDtypeStruct((M, V), out_dtype),
            grid_spec=pltpu.PrefetchScalarGridSpec(
                num_scalar_prefetch=0,
                grid=(grid_m,),
                in_specs=[
                    pl.BlockSpec((tm, H), lambda i: (i, 0)),
                    # Constant index_map: (H, V) weight stays resident.
                    pl.BlockSpec((H, V), lambda i: (0, 0)),
                ],
                out_specs=pl.BlockSpec((tm, V), lambda i: (i, 0)),
            ),
            compiler_params=pltpu.CompilerParams(
                dimension_semantics=("parallel",),
                vmem_limit_bytes=budget,
            ),
            cost_estimate=cost,
        )(x2, wt)
    else:
        grid_v = pl.cdiv(V, tv)
        cost = pl.CostEstimate(
            flops=4 * M * H * V + 6 * M * V,            # logits recomputed
            transcendentals=M * V + M * grid_v,
            bytes_accessed=M * H * x_it + 2 * H * V * w_it + M * V * o_it,
        )
        kernel = _make_generator_kernel_tiled(V, tv)
        out = pl.pallas_call(
            kernel,
            out_shape=jax.ShapeDtypeStruct((M, V), out_dtype),
            grid_spec=pltpu.PrefetchScalarGridSpec(
                num_scalar_prefetch=0,
                # (row tiles, {0: LSE pass, 1: write pass}, vocab tiles)
                grid=(grid_m, 2, grid_v),
                in_specs=[
                    pl.BlockSpec((tm, H), lambda i, p, v: (i, 0)),
                    pl.BlockSpec((H, tv), lambda i, p, v: (0, v)),
                ],
                # p*v keeps the output block index pinned during the LSE pass
                # so each output tile is written to HBM exactly once, right
                # after the write pass fills it.
                out_specs=pl.BlockSpec((tm, tv), lambda i, p, v: (i, p * v)),
                scratch_shapes=[
                    pltpu.VMEM((tm, 1), jnp.float32),   # running max
                    pltpu.VMEM((tm, 1), jnp.float32),   # running sum-exp
                ],
            ),
            compiler_params=pltpu.CompilerParams(
                dimension_semantics=("parallel", "arbitrary", "arbitrary"),
                vmem_limit_bytes=budget,
            ),
            cost_estimate=cost,
        )(x2, wt)

    return out.reshape(*lead, V)


def generator_reference(x, w):
    """Pure-JAX reference mirroring the PyTorch forward (f32, HIGHEST)."""
    logits = jnp.einsum("...h,vh->...v",
                        x.astype(jnp.float32), w.astype(jnp.float32),
                        precision=jax.lax.Precision.HIGHEST)
    return jax.nn.log_softmax(logits, axis=-1)


if __name__ == "__main__":
    # Small shapes consistent with the module: batch=2, seq=8, hidden=32,
    # vocab=512 (lane-dense: multiple of 128).
    B, S, H, V = 2, 8, 32, 512

    key = jax.random.PRNGKey(0)
    kx, kw = jax.random.split(key)
    x_f32 = jax.random.normal(kx, (B, S, H), dtype=jnp.float32)
    w = jax.random.normal(kw, (V, H), dtype=jnp.float32) * 0.05

    wt = prepare_generator_weight(w)          # hoisted out of the hot path
    ref = generator_reference(x_f32, w)

    # 1) fast path (full vocab resident), f32 activations; auto row split
    #    gives grid_m=2 so both v7x TensorCores get work.
    out_fast = jax.block_until_ready(generator_forward(x_f32, wt))
    assert out_fast.shape == (B, S, V)
    assert jnp.allclose(out_fast.astype(jnp.float32), ref,
                        rtol=2e-2, atol=2e-2), "fast path mismatch"

    # 2) vocab-tiled two-pass path (forced small tiles to exercise it).
    out_tiled = jax.block_until_ready(
        generator_forward(x_f32, wt, block_rows=8, block_vocab=128))
    assert out_tiled.shape == (B, S, V)
    assert jnp.allclose(out_tiled.astype(jnp.float32), ref,
                        rtol=2e-2, atol=2e-2), "tiled path mismatch"

    # 3) bf16 activations + weights (native MXU path), bf16 output.
    x_bf16 = x_f32.astype(jnp.bfloat16)
    wt_bf16 = wt.astype(jnp.bfloat16)
    ref_bf16 = generator_reference(x_bf16, w.astype(jnp.bfloat16))
    out_bf16 = jax.block_until_ready(generator_forward(x_bf16, wt_bf16))
    assert out_bf16.shape == (B, S, V)
    assert jnp.allclose(out_bf16.astype(jnp.float32),
                        ref_bf16.astype(jnp.float32),
                        rtol=2e-2, atol=5e-2), "bf16 path mismatch"

    print("KERNEL_OK")
</pallas_src>

<mosaic_0001>
module attributes {stable_mosaic.version = 11 : i64} {
  func.func @_generator_kernel_fast(%arg0: i32, %arg1: memref<8x32xf32, #tpu.memory_space<vmem>>, %arg2: memref<32x512xf32, #tpu.memory_space<vmem>>, %arg3: memref<8x512xf32, #tpu.memory_space<vmem>>) attributes {dimension_semantics = [#tpu.dimension_semantics<parallel>], iteration_bounds = array<i64: 2>, scalar_prefetch = 0 : i64, scratch_operands = 0 : i64, tpu.core_type = #tpu.core_type<tc>, window_params = [{transform_indices = @transform_0, window_bounds = array<i64: 8, 32>}, {pipeline_mode = #tpu.pipeline_mode<synchronous>, transform_indices = @transform_1, window_bounds = array<i64: 32, 512>}, {transform_indices = @transform_2, window_bounds = array<i64: 8, 512>}]} {
    %c0 = arith.constant 0 : index
    %c0_0 = arith.constant 0 : index
    %0 = vector.load %arg1[%c0, %c0_0] : memref<8x32xf32, #tpu.memory_space<vmem>>, vector<8x32xf32>
    %c0_1 = arith.constant 0 : index
    %c0_2 = arith.constant 0 : index
    %1 = vector.load %arg2[%c0_1, %c0_2] : memref<32x512xf32, #tpu.memory_space<vmem>>, vector<32x512xf32>
    %cst = arith.constant dense<0.000000e+00> : vector<8x512xf32>
    %2 = tpu.matmul %0, %1, %cst {dimension_numbers = #tpu.dot_dimension_numbers<[1], [0], [0], [1], [0, 0, 1, 1], [], []>} : vector<8x32xf32>, vector<32x512xf32>, vector<8x512xf32> -> vector<8x512xf32>
    %cst_3 = arith.constant dense<0xFF800000> : vector<8xf32>
    %3 = vector.multi_reduction <maximumf>, %2, %cst_3 [1] : vector<8x512xf32> to vector<8xf32>
    %4 = vector.shape_cast %3 : vector<8xf32> to vector<8x1xf32>
    %5 = vector.broadcast %4 : vector<8x1xf32> to vector<8x512xf32>
    %6 = arith.subf %2, %5 : vector<8x512xf32>
    %7 = math.exp %6 : vector<8x512xf32>
    %cst_4 = arith.constant dense<0.000000e+00> : vector<8xf32>
    %8 = vector.multi_reduction <add>, %7, %cst_4 [1] : vector<8x512xf32> to vector<8xf32>
    %9 = vector.shape_cast %8 : vector<8xf32> to vector<8x1xf32>
    %10 = math.log %9 : vector<8x1xf32>
    %11 = vector.broadcast %10 : vector<8x1xf32> to vector<8x512xf32>
    %12 = arith.subf %6, %11 : vector<8x512xf32>
    %c0_5 = arith.constant 0 : index
    %c0_6 = arith.constant 0 : index
    %13 = vector.load %arg3[%c0_5, %c0_6] : memref<8x512xf32, #tpu.memory_space<vmem>>, vector<8x512xf32>
    tpu.vector_store %arg3[%c0_5, %c0_6], %12 {strides = array<i32>} : memref<8x512xf32, #tpu.memory_space<vmem>>, vector<8x512xf32>,
    return
  }
  func.func @transform_0(%arg0: i32) -> (i32, i32) {
    %c0_i32 = arith.constant 0 : i32
    %c0_i32_0 = arith.constant 0 : i32
    return %arg0, %c0_i32 : i32, i32
  }
  func.func @transform_1(%arg0: i32) -> (i32, i32) {
    %c0_i32 = arith.constant 0 : i32
    %c0_i32_0 = arith.constant 0 : i32
    %c0_i32_1 = arith.constant 0 : i32
    return %c0_i32, %c0_i32_0 : i32, i32
  }
  func.func @transform_2(%arg0: i32) -> (i32, i32) {
    %c0_i32 = arith.constant 0 : i32
    %c0_i32_0 = arith.constant 0 : i32
    return %arg0, %c0_i32 : i32, i32
  }
}

</mosaic_0001>

<bundles_post_ra>
// kernel: tpu_custom_call.1
= control target key start
LH: loop header
LB: loop body
LE: loop exit
PB: predicated region body
PF: predicated region fallthrough
CT: control target
= control target key end

     0   :  { %7 = vsyncpa [#allocation3], 0  ;;  %s919_s0 = inlined_call_operand.hbm [shape: f32[16,32], index: 0, kind: input, shape index: {}]   ;;  %s920_s1 = inlined_call_operand.hbm [shape: f32[32,512], index: 1, kind: input, shape index: {}]   ;;  %s921_s2 = inlined_call_operand.hbm [shape: f32[16,512], index: 2, kind: output, shape index: {}]  }
   0x1   :  { %9 = vsyncpa [#allocation3 + $0x1], 0 }
   0x2   :  { %10 = vsyncpa [#allocation6], 0 }
   0x3   :  { %11 = vsyncpa [#allocation4], 0 }
   0x4   :  { %13 = vsyncpa [#allocation4 + $0x1], 0  ;;  %s719_s9 = smov 0   ;;  %s721_s10 = smov 0  }
   0x5   :  { %s723_s11 = smov 0   ;;  %s725_s12 = smov 0  }
   0x6 LB: > { %s740_s13 = sadd.s32 4294967295, %s696_s12   ;;  %s464_s14 = sadd.s32 4294967294, %s696_s12   ;;  %s696_s12 = sphi %s725_s12, %s941_s12   ;;  %s692_s11 = sphi %s723_s11, %s940_s11   ;;  %s688_s10 = sphi %s721_s10, %s939_s10   ;;  %s684_s9 = sphi %s719_s9, %s938_s9  }
   0x7   : > { %p39_p0 = scmp.ne.s32.totalorder %s688_s10, %s684_s9  ;;  %p922_p1 = scmp.eq.s32.totalorder %s740_s13, 0 }
   0x8   : > { %p90_p3 = scmp.eq.s32.totalorder %s464_s14, 1  ;;  %p465_p5 = scmp.ge.s32.totalorder %s696_s12, 1 }
   0x9   : > { %p749_p4 = por %p922_p1, %p39_p0  ;;  %p97_p7 = scmp.lt.s32.totalorder %s696_s12, 3 }
   0xa   : > { %p754_p6 = por %p90_p3, %p39_p0  ;;  %s698_s18 = smov [#allocation5]  }
   0xb   : > { %s925_s15 = scalar_select %p749_p4, 1, 0 }
   0xc   : > { %s926_s16 = scalar_select %p754_p6, 1, 0 }
   0xd   : > { %p759_p8 = pnand %p465_p5, %p97_p7  ;;  %s109_s19 = sshll.u32 %s698_s18, 4  ;;  %s763_s19 = int_to_ptr.vmem [resolvable:$true] %s109_s19 }
   0xe   : > { %s775_s21 = sadd.s32 1, %s696_s12   ;;  %s26_s22 = sadd.s32 1, %s692_s11 }
   0xf   : > { %s927_s17 = scalar_select %p759_p8, 1, 0 }
  0x10   : > { %p506_p9 = pneg %p759_p8  ;;  %s23_s23 = ssub.s32 %s696_s12, %s775_s21 }
  0x11   : > { %s568_s26 = scalar_lea.hbm %s920_s1, 2048 }
  0x12   : > { %p770_p11 = pnand %p506_p9, %p922_p1  ;;  %p569_p12 = scmp.ne.s32.totalorder %s920_s1, %s568_s26 }
  0x13   : > { %p575_p5 = scmp.lt.u32.totalorder %s568_s26, %s920_s1 }
  0x14   : > { %p570_p13 = pneg %p770_p11 }
  0x16   : > { %p571_p0 = pnand %p570_p13, %p569_p12 }
  0x18   : > { %p572_p3 = pneg %p571_p0 }
  0x1a   : > { %p577_p7 = pnand %p575_p5, %p572_p3 }
  0x1c   : > { %580 = shalt.err (!%p577_p7)
}
  0x1d   : > { %s581_s3 = scalar_lea.vmem %s763_s19, 2048  ;;  %p589_p2 = scmp.lt.s32.totalorder %s763_s19, %s763_s19 }
  0x1e   : > { %p582_p9 = scmp.ne.s32.totalorder %s763_s19, %s581_s3  ;;  %p590_p6 = scmp.lt.s32.totalorder %s581_s3, %s581_s3 }
  0x20   : > { %p584_p10 = pnand %p582_p9, %p570_p13  ;;  %p591_p4 = por %p590_p6, %p589_p2 }
  0x22   : > { %p585_p1 = pneg %p584_p10 }
  0x24   : > { %p592_p8 = pnand %p591_p4, %p585_p1 }
  0x26   : > { %595 = shalt.err (!%p592_p8)
}
  0x27   : > { %s699_s4 = smov 512   ;;  %s700_s5 = smov 32  }
  0x28   : > { %509 = dma.hbm_to_vmem [thread:$0]  (!%p770_p11), %s920_s1, 2048, %s763_s19, [#allocation6], %s699_s4, %s699_s4, %s700_s5  }
  0x29   : > { %p24_p2 = scmp.eq.s32.totalorder %s23_s23, 0  ;;  %p33_p1 = scmp.ne.s32.totalorder %s692_s11, %s688_s10 }
  0x2a   : > { %p34_p4 = scmp.eq.s32.totalorder %s696_s12, 0  ;;  %p519_p6 = scmp.lt.s32.totalorder %s696_s12, 2 }
  0x2b   : > { %s806_s8 = scalar_select %p24_p2, %s692_s11, %s26_s22  }
  0x2c   : > { %p35_p8 = por %p34_p4, %p33_p1  ;;  %p929_p10 = scmp.eq.s32.totalorder %s740_s13, 1 }
  0x2d   : > { %s123_s18 = sand.u32 1, %s692_s11   ;;  %s469_s24 = sshll.u32 %s696_s12, 7 }
  0x2e   : > { %p810_p12 = por %p929_p10, %p33_p1  ;;  %s468_s25 = sshll.u32 %s123_s18, 3 }
  0x2f   : > { %s819_s27 = scalar_lea.hbm %s919_s0, %s469_s24  ;;  %s127_s19 = scalar_lea.vmem [#allocation2], %s468_s25 }
  0x30   : > { %s134_s22 = sshll.u32 %s127_s19, 4  ;;  %p821_p11 = pnand %p519_p6, %p35_p8  ;;  %s825_s22 = int_to_ptr.vmem [resolvable:$true] %s134_s22 }
  0x31   : > { %s124_s28 = scalar_lea.sflag [#allocation3], %s123_s18  ;;  %s596_s29 = scalar_lea.hbm %s819_s27, 128 }
  0x32   : > { %p597_p13 = scmp.ne.s32.totalorder %s819_s27, %s596_s29  ;;  %p598_p0 = pneg %p821_p11 }
  0x33   : > { %s601_s4 = scalar_lea.hbm %s919_s0, 256  ;;  %p602_p7 = scmp.lt.u32.totalorder %s819_s27, %s919_s0 }
  0x34   : > { %p599_p3 = pnand %p598_p0, %p597_p13  ;;  %p603_p9 = scmp.lt.u32.totalorder %s601_s4, %s596_s29 }
  0x35   : > { %p605_p1 = scmp.lt.u32.totalorder %s596_s29, %s819_s27 }
  0x36   : > { %p600_p5 = pneg %p599_p3  ;;  %p604_p2 = por %p603_p9, %p602_p7 }
  0x38   : > { %p606_p4 = por %p605_p1, %p604_p2 }
  0x3a   : > { %p607_p6 = pnand %p606_p4, %p600_p5 }
  0x3c   : > { %610 = shalt.err (!%p607_p6)
}
  0x3d   : > { %s611_s7 = scalar_lea.vmem %s825_s22, 128  ;;  %s701_s18 = smov [#allocation2]  }
  0x3e   : > { %p612_p8 = scmp.ne.s32.totalorder %s825_s22, %s611_s7  ;;  %s616_s24 = sshll.u32 %s701_s18, 4  ;;  %s617_s24 = int_to_ptr.vmem [resolvable:$false] %s616_s24 }
  0x3f   : > { %s618_s25 = scalar_lea.vmem %s617_s24, 256  ;;  %p619_p3 = scmp.lt.s32.totalorder %s825_s22, %s617_s24 }
  0x40   : > { %p614_p10 = pnand %p612_p8, %p598_p0  ;;  %p620_p7 = scmp.lt.s32.totalorder %s618_s25, %s611_s7 }
  0x42   : > { %p615_p13 = pneg %p614_p10  ;;  %p621_p9 = por %p620_p7, %p619_p3 }
  0x44   : > { %p622_p2 = pnand %p621_p9, %p615_p13 }
  0x46   : > { %625 = shalt.err (!%p622_p2)
}
  0x47   : > { %513 = dma.hbm_to_vmem [thread:$0]  (!%p821_p11), %s819_s27, 128, %s825_s22, %s124_s28  }
  0x48   : > { %p932_p5 = scmp.ne.s32.totalorder %s927_s17, 0 }
  0x49   : > { %s855_s20 = sand.u32 (!%p932_p5), 1, %s688_s10   ;;  %p933_p0 = scmp.ne.s32.totalorder (!%p932_p5), %s925_s15, 0 }
  0x4a   : > { %143 = sbr.rel (%p932_p5) target bundleno = 651 (0x28b), region = 28  ;;  %s471_s26 = sshll.u32 (!%p932_p5), %s855_s20, 3 }
  0x4b   : > { %s146_s19 = scalar_lea.sflag (!%p932_p5), [#allocation3], %s855_s20  ;;  %s859_s29 = scalar_lea.vmem (!%p932_p5), [#allocation2], %s471_s26 }
  0x51   : > { %671 = dma.done.wait (%p933_p0), %s146_s19, 128  }
  0x52   : > { %673 = vsyncadd (%p933_p0), %s146_s19, 4294967168  ;;  %p934_p11 = scmp.eq.s32.totalorder %s740_s13, 0 }
  0x54   : > { %675 = dma.done.wait (%p934_p11), [#allocation6], 2048   ;;  %p935_p1 = pmov %p934_p11 }
  0x55   : > { %v702_v0 = vmov 0.0   ;;  %v176_v1 = vld [vmem:[#allocation5 + $0x8] sm:$0xff]  ;;  %v178_v3 = vld [vmem:[#allocation5 + $0x18] sm:$0xff]  ;;  %v175_v6 = vld [vmem:[#allocation5] sm:$0xff]  ;;  %vm191_vm0 = vcmask 261120   ;;  %s473_s15 = sshll.u32 %s855_s20, 5 }
  0x56   : > { %677 = vsyncadd (%p935_p1), [#allocation6], 4294965248  ;;  %259 = vmatprep.mubr.f32.mxu0 %v702_v0  ;;  %330 = vmatprep.mubr.f32.mxu1 %v702_v0  ;;  %v180_v2 = vld [vmem:[#allocation5 + $0x28] sm:$0xff]  ;;  %v182_v5 = vld [vmem:[#allocation5 + $0x38] sm:$0xff]  ;;  %s481_s17 = sshll.u32 %s740_s13, 9  ;;  %s173_s27 = scalar_lea.vmem [#allocation7], %s473_s15 }
  0x57   : > { %v482_v4 = vpack.c.bf16 %v180_v2, %v176_v1  ;;  %v179_v7 = vld [vmem:[#allocation5 + $0x20] sm:$0xff]  ;;  %v490_v8 = vpack.c.bf16 %v182_v5, %v178_v3  ;;  %v177_v10 = vld [vmem:[#allocation5 + $0x10] sm:$0xff]  ;;  %v184_v12 = vld [vmem:[#allocation5 + $0x48] sm:$0xff]  ;;  %s384_s22 = sshll.u32 %s173_s27, 4  ;;  %s875_s30 = scalar_lea.hbm %s921_s2, %s481_s17  ;;  %s877_s22 = int_to_ptr.vmem [resolvable:$true] %s384_s22 }
  0x58   : > { %v484_v9 = vpack.c.bf16 %v179_v7, %v175_v6  ;;  %v181_v11 = vld [vmem:[#allocation5 + $0x30] sm:$0xff]  ;;  %v188_v14 = vld [vmem:[#allocation5 + $0x68] sm:$0xff]  ;;  %v186_v15 = vld [vmem:[#allocation5 + $0x58] sm:$0xff]  ;;  %s370_s13 = scalar_lea.sflag [#allocation4], %s855_s20  ;;  %s626_s3 = scalar_lea.vmem %s877_s22, 512 }
  0x59   : > { %483 = vmatprep.subr.bf16.mxu0 %v482_v4  ;;  %v492_v13 = vpack.c.bf16 %v181_v11, %v177_v10  ;;  %v190_v16 = vld [vmem:[#allocation5 + $0x78] sm:$0xff]  ;;  %491 = vmatprep.subr.bf16.mxu1 %v490_v8  ;;  %v486_v17 = vpack.c.bf16 %v188_v14, %v184_v12  ;;  %v183_v19 = vld [vmem:[#allocation5 + $0x40] sm:$0xff]  ;;  %v185_v21 = vld [vmem:[#allocation5 + $0x50] sm:$0xff]  ;;  %p627_p4 = scmp.ne.s32.totalorder %s877_s22, %s626_s3  ;;  %s703_s4 = smov [#allocation7]  }
  0x5a   : > { %485 = vmatpush1.bf16.msra.mxu0 %v484_v9  ;;  %v494_v18 = vpack.c.bf16 %v190_v16, %v186_v15  ;;  %v187_v20 = vld [vmem:[#allocation5 + $0x60] sm:$0xff]  ;;  %v189_v23 = vld [vmem:[#allocation5 + $0x70] sm:$0xff]  ;;  %s630_s5 = sshll.u32 %s703_s4, 4  ;;  %s631_s5 = int_to_ptr.vmem [resolvable:$false] %s630_s5 }
  0x5b   : > { %493 = vmatpush1.bf16.msra.mxu1 %v492_v13  ;;  %v488_v22 = vpack.c.bf16 %v187_v20, %v183_v19  ;;  %487 = vmatprep.subr.bf16.mxu0 %v486_v17  ;;  %v496_v24 = vpack.c.bf16 %v189_v23, %v185_v21  ;;  %v174_v25 = vld [vmem:[%s859_s29] sm:$0xff]  ;;  %p628_p6 = pnand %p627_p4, %p810_p12  ;;  %s632_s6 = scalar_lea.vmem %s631_s5, 1024 }
  0x5c   : > { %495 = vmatprep.subr.bf16.mxu1 %v494_v18  ;;  %p633_p10 = scmp.lt.s32.totalorder %s877_s22, %s631_s5  ;;  %p634_p13 = scmp.lt.s32.totalorder %s632_s6, %s626_s3 }
  0x5d   : > { %p629_p8 = pneg %p628_p6 }
  0x5e   : > { %489 = vmatpush1.bf16.msra.mxu0 %v488_v22  ;;  %p635_p3 = por %p634_p13, %p633_p10 }
  0x5f   : > { %497 = vmatpush1.bf16.msra.mxu1 %v496_v24 }
  0x60   : > { %p636_p7 = pnand %p635_p3, %p629_p8 }
  0x61   : > { %474 = vmatmul.mubr.msk.f32.vlgmr.msra.gmra.mrb[0].mxu0 %vm191_vm0, %v174_v25 }
  0x62   : > { %475 = vmatmul.mubr.msk.f32.vlgmr.msra.gmra.mrb[0].mxu1 %vm191_vm0, %v174_v25 }
 0x134   : > { %v261_v26 = vpop.f32.mrb[0].mxu0 }
 0x135   : > { %v332_v27 = vpop.f32.mrb[0].mxu1  ;;  %v263_v28 = vpop.f32.mrb[1].mxu0 }
 0x136   : > { %v337_v29 = vmax.f32 %v261_v26, %v263_v28  ;;  %v334_v30 = vpop.f32.mrb[1].mxu1 }
 0x137   : > { %v338_v31 = vmax.f32 %v332_v27, %v334_v30 }
 0x139   : > { %v339_v32 = vmax.f32 %v337_v29, %v338_v31 }
 0x13b   : > { %340 = vmax.xlane.f32.xlu0 %v339_v32 }
 0x1c8   : > { %v341_v33 = vpop.xlane.xlu0 %340 }
 0x1c9   : > { %v342_v34 = vsub.f32 %v261_v26, %v341_v33  ;;  %v343_v35 = vsub.f32 %v263_v28, %v341_v33  ;;  %v344_v36 = vsub.f32 %v332_v27, %v341_v33  ;;  %v345_v37 = vsub.f32 %v334_v30, %v341_v33 }
 0x1cb   : > { %v346_v38 = vmul.f32 1.442695, %v342_v34  ;;  %v348_v39 = vmul.f32 1.442695, %v343_v35  ;;  %v350_v40 = vmul.f32 1.442695, %v344_v36 }
 0x1cc   : > { %v352_v41 = vmul.f32 1.442695, %v345_v37 }
 0x1cd   : > { %558 = vpow2.f32 %v346_v38 }
 0x1ce   : > { %560 = vpow2.f32 %v348_v39 }
 0x1cf   : > { %562 = vpow2.f32 %v350_v40 }
 0x1d0   : > { %564 = vpow2.f32 %v352_v41 }
 0x1d7   : > { %v559_v42 = vpop.eup %558 }
 0x1d8   : > { %v561_v43 = vpop.eup %560 }
 0x1d9   : > { %v354_v44 = vadd.f32 %v561_v43, %v559_v42  ;;  %v563_v45 = vpop.eup %562 }
 0x1da   : > { %v565_v47 = vpop.eup %564 }
 0x1db   : > { %v355_v46 = vadd.f32 %v563_v45, %v354_v44 }
 0x1dd   : > { %v356_v48 = vadd.f32 %v565_v47, %v355_v46 }
 0x1df   : > { %357 = vadd.xlane.f32.xlu0 %v356_v48 }
 0x26c   : > { %v358_v49 = vpop.xlane.xlu0 %357 }
 0x26d   : > { %566 = vlog2.f32 %v358_v49 }
 0x277   : > { %v567_v50 = vpop.eup %566 }
 0x278   : > { %v360_v51 = vmul.f32 0.6931472, %v567_v50 }
 0x27a   : > { %v361_v52 = vsub.f32 %v342_v34, %v360_v51  ;;  %v362_v53 = vsub.f32 %v343_v35, %v360_v51  ;;  %v363_v54 = vsub.f32 %v344_v36, %v360_v51  ;;  %v364_v55 = vsub.f32 %v345_v37, %v360_v51 }
 0x27c   : > { %365 = vst [vmem:[%s173_s27] sm:$0xff] %v361_v52  ;;  %366 = vst [vmem:[%s173_s27 + $0x8] sm:$0xff] %v362_v53 }
 0x27d   : > { %367 = vst [vmem:[%s173_s27 + $0x10] sm:$0xff] %v363_v54  ;;  %368 = vst [vmem:[%s173_s27 + $0x18] sm:$0xff] %v364_v55 }
 0x27e   : > { %639 = shalt.err (!%p636_p7)
}
 0x27f   : > { %s640_s7 = scalar_lea.hbm %s875_s30, 512  ;;  %s644_s25 = scalar_lea.hbm %s921_s2, 1024 }
 0x280   : > { %p641_p9 = scmp.ne.s32.totalorder %s875_s30, %s640_s7  ;;  %p645_p0 = scmp.lt.u32.totalorder %s875_s30, %s921_s2 }
 0x281   : > { %p646_p11 = scmp.lt.u32.totalorder %s644_s25, %s640_s7  ;;  %p648_p4 = scmp.lt.u32.totalorder %s640_s7, %s875_s30 }
 0x282   : > { %p642_p2 = pnand %p641_p9, %p810_p12 }
 0x283   : > { %p647_p1 = por %p646_p11, %p645_p0 }
 0x284   : > { %p643_p5 = pneg %p642_p2 }
 0x285   : > { %p649_p6 = por %p648_p4, %p647_p1 }
 0x287   : > { %p650_p8 = pnand %p649_p6, %p643_p5 }
 0x289   : > { %653 = shalt.err (!%p650_p8)
}
 0x28a   : > { %504 = dma.vmem_to_hbm [thread:$0]  (%p810_p12), %s877_s22, 512, %s875_s30, %s370_s13  }
 0x28b PF: > { %s396_s19 = sand.u32 1, %s684_s9   ;;  %p936_p10 = scmp.ne.s32.totalorder %s926_s16, 0 }
 0x28c   : > { %p937_p13 = scmp.ge.s32.totalorder %s696_s12, 2  ;;  %s397_s29 = scalar_lea.sflag [#allocation4], %s396_s19 }
 0x28e   : > { %p515_p3 = pnand %p937_p13, %p936_p10 }
 0x290   : > { %679 = dma.done.wait (!%p515_p3), %s397_s29, 512  }
 0x291   : > { %681 = vsyncadd (!%p515_p3), %s397_s29, 4294966784  ;;  %p16_p7 = scmp.ge.s32.totalorder %s775_s21, 4   ;;  %s938_s9 = smov %s688_s10 }
 0x292   : > { %s939_s10 = smov %s692_s11  ;;  %s940_s11 = smov %s806_s8 }
 0x293   : > { %s941_s12 = smov %s775_s21  ;;  %18 = sbr.rel (!%p16_p7) target bundleno = 6 (0x6), region = 77 }
 0x29a   :  { %402 = vsyncpa [#allocation3], 1 }
 0x29b   :  { %404 = vsyncpa [#allocation3 + $0x1], 1 }
 0x29c   :  { %405 = vsyncpa [#allocation6], 1 }
 0x29d   :  { %406 = vsyncpa [#allocation4], 1 }
 0x29e   :  { %408 = vsyncpa [#allocation4 + $0x1], 1 }

</bundles_post_ra>
